<compile_context>
chip_gen: v7x
topology: tpu7x:2x2x1
jax: 0.10.0
libtpu: 0.0.40
codegen_flags: <defaults>
</compile_context>

<pallas_src>
import functools

import jax
import jax.numpy as jnp
import numpy as np
from jax.experimental import pallas as pl
from jax.experimental.pallas import tpu as pltpu

BN_EPS = 1e-5
BN_SCALE = 1.0 / np.sqrt(1.0 + BN_EPS)  # eval-mode BN with gamma=1, beta=0, mean=0, var=1


def _round_up(x, m):
    return ((x + m - 1) // m) * m


def _cdiv(a, b):
    return -(-a // b)


# ----------------------------------------------------------------------------
# Generation-aware VMEM budgeting
# ----------------------------------------------------------------------------
@functools.lru_cache(maxsize=None)
def _vmem_capacity_bytes():
    try:
        info = pltpu.get_tpu_info()
        for name in ("vmem_capacity_bytes", "vmem_size_bytes", "vmem_bytes"):
            v = getattr(info, name, None)
            if v:
                return int(v)
    except Exception:
        pass
    return 64 * 1024 * 1024  # conservative (v7x-sized) fallback


def _vmem_limit_bytes():
    # ~100 MiB on v5e/v6e (128 MiB physical), ~50 MiB on v7x (64 MiB physical)
    return int(_vmem_capacity_bytes() * 0.78)


def _fused_vmem_budget():
    # what our double-buffered blocks + accumulator scratch may occupy
    return int(_vmem_capacity_bytes() * 0.60)


# ----------------------------------------------------------------------------
# Pallas kernels
# ----------------------------------------------------------------------------
def _mm_affine_kernel(a_ref, b_ref, s_ref, c_ref, o_ref, acc_ref, *, relu):
    """out = relu?((A @ B) * scale + bias), accumulated over the K grid axis."""
    k = pl.program_id(2)

    @pl.when(k == 0)
    def _():
        acc_ref[...] = jnp.zeros_like(acc_ref)

    acc_ref[...] += jnp.dot(a_ref[...], b_ref[...], preferred_element_type=jnp.float32)

    @pl.when(k == pl.num_programs(2) - 1)
    def _():
        y = acc_ref[...] * s_ref[...] + c_ref[...]
        if relu:
            y = jnp.maximum(y, 0.0)
        o_ref[...] = y.astype(o_ref.dtype)


def _conv_taps_kernel(a_ref, b_ref, s_ref, c_ref, o_ref, acc_ref,
                      *, taps, wp, tile_m, nbatch, relu):
    """Direct (fused-im2col) stride-1 conv over one spatial row tile, all batch images.

    a_ref : (N, win, tkc) bf16 — flat padded rows of the current row window (tile + halo).
    b_ref : (T, tkc, tnc) bf16 — weights for this (Cin tile, Cout tile), T = KH*KW taps.
    s_ref / c_ref : (1, tnc) f32 per-Cout affine (eval BN and/or conv bias).
    o_ref : (N, tile_m, tnc); acc_ref : (N, tile_m, tnc) f32 scratch.
    Tap (kh, kw) is the static row offset d = kh*Wp + kw into the flat row axis.
    The batch loop is inside the kernel so weight blocks are DMA'd once per (k, j) tile.
    """
    k = pl.program_id(2)

    @pl.when(k == 0)
    def _():
        acc_ref[...] = jnp.zeros_like(acc_ref)

    for n in range(nbatch):
        acc = acc_ref[n, :, :]
        for t, (kh, kw) in enumerate(taps):
            d = kh * wp + kw
            a = a_ref[n, pl.ds(d, tile_m), :]
            acc = acc + jnp.dot(a, b_ref[t, :, :], preferred_element_type=jnp.float32)
        acc_ref[n, :, :] = acc
    # TODO(synk): on v7x, drive the MXU explicitly (matmul_push_rhs/acc_lhs/pop) to
    # accumulate the taps in the MRB and avoid the VMEM accumulator round trips.

    @pl.when(k == pl.num_programs(2) - 1)
    def _():
        y = acc_ref[...] * s_ref[...] + c_ref[...]
        if relu:
            y = jnp.maximum(y, 0.0)
        o_ref[...] = y.astype(o_ref.dtype)


def _scale_offset_kernel(x_ref, s_ref, b_ref, o_ref):
    """o = x * scale + offset, with (1, cols) scale/offset broadcast over rows."""
    o_ref[...] = x_ref[...] * s_ref[...] + b_ref[...]


# ----------------------------------------------------------------------------
# Matmul (im2col fallback path)
# ----------------------------------------------------------------------------
def matmul_affine(a, b, scale, bias, *, relu=False, out_dtype=jnp.float32):
    """Pallas tiled matmul with fused per-column affine + optional ReLU.

    bf16 operands, f32 accumulation.  Lane-dense column tiles (>=128)."""
    M, K = a.shape
    _, N = b.shape
    tm = min(512, _round_up(M, 8))
    tk = min(512, _round_up(K, 128))
    n_p = _round_up(N, 128)
    if n_p <= 128:
        tn = 128
    elif n_p % 512 == 0:
        tn = 512
    elif n_p % 256 == 0:
        tn = 256
    else:
        tn = 128
    Mp, Kp, Np = _round_up(M, tm), _round_up(K, tk), n_p

    ap = jnp.pad(a, ((0, Mp - M), (0, Kp - K))).astype(jnp.bfloat16)
    bp = jnp.pad(b, ((0, Kp - K), (0, Np - N))).astype(jnp.bfloat16)
    sp = jnp.pad(scale.reshape(1, -1).astype(jnp.float32), ((0, 0), (0, Np - N)))
    cp = jnp.pad(bias.reshape(1, -1).astype(jnp.float32), ((0, 0), (0, Np - N)))
    grid = (Mp // tm, Np // tn, Kp // tk)

    out_bytes = jnp.dtype(out_dtype).itemsize
    cost = pl.CostEstimate(
        flops=2 * Mp * Kp * Np,
        transcendentals=0,
        bytes_accessed=2 * int(ap.size) + 2 * int(bp.size) + out_bytes * Mp * Np,
    )

    out = pl.pallas_call(
        functools.partial(_mm_affine_kernel, relu=relu),
        out_shape=jax.ShapeDtypeStruct((Mp, Np), out_dtype),
        grid_spec=pltpu.PrefetchScalarGridSpec(
            num_scalar_prefetch=0,
            grid=grid,
            in_specs=[
                pl.BlockSpec((tm, tk), lambda i, j, k: (i, k)),
                pl.BlockSpec((tk, tn), lambda i, j, k: (k, j)),
                pl.BlockSpec((1, tn), lambda i, j, k: (0, j)),
                pl.BlockSpec((1, tn), lambda i, j, k: (0, j)),
            ],
            out_specs=pl.BlockSpec((tm, tn), lambda i, j, k: (i, j)),
            scratch_shapes=[pltpu.VMEM((tm, tn), jnp.float32)],
        ),
        compiler_params=pltpu.CompilerParams(
            dimension_semantics=("parallel", "parallel", "arbitrary"),
            vmem_limit_bytes=_vmem_limit_bytes(),
        ),
        cost_estimate=cost,
    )(ap, bp, sp, cp)
    return out[:M, :N]


# ----------------------------------------------------------------------------
# Conv wrappers
# ----------------------------------------------------------------------------
def _fused_tiles(Cin, Cout):
    """Lane-dense Cin/Cout padding and tile widths for the fused conv."""
    cin_p = _round_up(Cin, 128)
    if cin_p <= 512:
        tkc = cin_p
    else:
        tkc = 128
        for cand in (512, 384, 256, 128):
            if cin_p % cand == 0:
                tkc = cand
                break
    cout_p = _round_up(Cout, 128)
    if cout_p <= 256:
        tnc = cout_p
    elif cout_p % 256 == 0:
        tnc = 256
    else:
        tnc = 128
    return cin_p, tkc, cout_p, tnc


def _conv2d_fused_taps(x, w, scale, bias, *, padding, relu, out_dtype, tile_oh):
    """Stride-1 NHWC conv with im2col fused into the Pallas kernel (tap-offset trick),
    spatially tiled over output rows, batch handled inside the kernel."""
    N, H, W, Cin = x.shape
    KH, KW, _, Cout = w.shape
    Hp, Wp = H + 2 * padding, W + 2 * padding
    Ho, Wo = Hp - KH + 1, Wp - KW + 1
    T = KH * KW
    extra = 1 if KW > 1 else 0          # one extra zero image row covers the largest tap offset

    cin_p, tkc, cout_p, tnc = _fused_tiles(Cin, Cout)

    R = _cdiv(Ho, tile_oh)
    Ho_pad = R * tile_oh
    tile_m = tile_oh * Wp               # Wp-Wo columns per output row are garbage; sliced off
    win = (tile_oh + KH - 1 + extra) * Wp
    flat_rows = (Ho_pad + KH - 1 + extra) * Wp

    # Single pad (spatial + row-tile pad + extra row + Cin pad), free reshape, bf16 cast.
    bot_pad = padding + (Ho_pad - Ho) + extra
    xp = jnp.pad(x, ((0, 0), (padding, bot_pad), (padding, padding), (0, cin_p - Cin)))
    a_flat = xp.reshape(N, flat_rows, cin_p).astype(jnp.bfloat16)

    # Overlapping (tile + halo) row windows materialized once: ~ (KH-1+extra)/tile_oh
    # extra HBM traffic, vs. the 9x blowup of full im2col.  Degenerates to a reshape
    # when R == 1.
    a_win = jnp.stack(
        [a_flat[:, r * tile_m: r * tile_m + win, :] for r in range(R)], axis=1
    )                                                              # (N, R, win, cin_p)

    b = jnp.pad(
        w.reshape(T, Cin, Cout), ((0, 0), (0, cin_p - Cin), (0, cout_p - Cout))
    ).astype(jnp.bfloat16)
    sp = jnp.pad(scale.reshape(1, -1).astype(jnp.float32), ((0, 0), (0, cout_p - Cout)))
    cp = jnp.pad(bias.reshape(1, -1).astype(jnp.float32), ((0, 0), (0, cout_p - Cout)))

    grid = (R, cout_p // tnc, cin_p // tkc)
    taps = tuple((kh, kw) for kh in range(KH) for kw in range(KW))

    out_bytes = jnp.dtype(out_dtype).itemsize
    cost = pl.CostEstimate(
        flops=2 * N * Ho_pad * Wp * cin_p * cout_p * T,
        transcendentals=0,
        bytes_accessed=int(a_win.size) * 2 * (cout_p // tnc)
        + int(b.size) * 2 * R
        + N * Ho_pad * Wp * cout_p * out_bytes,
    )

    out = pl.pallas_call(
        functools.partial(_conv_taps_kernel, taps=taps, wp=Wp, tile_m=tile_m,
                          nbatch=N, relu=relu),
        out_shape=jax.ShapeDtypeStruct((N, R, tile_m, cout_p), out_dtype),
        grid_spec=pltpu.PrefetchScalarGridSpec(
            num_scalar_prefetch=0,
            grid=grid,
            in_specs=[
                pl.BlockSpec((N, None, win, tkc), lambda r, j, k: (0, r, 0, k)),
                pl.BlockSpec((T, tkc, tnc), lambda r, j, k: (0, k, j)),
                pl.BlockSpec((1, tnc), lambda r, j, k: (0, j)),
                pl.BlockSpec((1, tnc), lambda r, j, k: (0, j)),
            ],
            out_specs=pl.BlockSpec((N, None, tile_m, tnc), lambda r, j, k: (0, r, 0, j)),
            scratch_shapes=[pltpu.VMEM((N, tile_m, tnc), jnp.float32)],
        ),
        compiler_params=pltpu.CompilerParams(
            dimension_semantics=("parallel", "parallel", "arbitrary"),
            vmem_limit_bytes=_vmem_limit_bytes(),
        ),
        cost_estimate=cost,
    )(a_win, b, sp, cp)

    # drop garbage rows (oh >= Ho), garbage columns (ow >= Wo) and channel padding
    out = out.reshape(N, Ho_pad, Wp, cout_p)
    return out[:, :Ho, :Wo, :Cout]


def _conv2d_im2col(x, w, scale, bias, *, stride, padding, relu, out_dtype):
    """Fallback path (strided convs / pathological shapes): XLA im2col + Pallas matmul."""
    N, H, W, Cin = x.shape
    KH, KW, _, Cout = w.shape
    xp = jnp.pad(x, ((0, 0), (padding, padding), (padding, padding), (0, 0)))
    Ho = (H + 2 * padding - KH) // stride + 1
    Wo = (W + 2 * padding - KW) // stride + 1

    patches = []
    for kh in range(KH):
        for kw in range(KW):
            patches.append(xp[:, kh:kh + stride * Ho:stride, kw:kw + stride * Wo:stride, :])
    patches = jnp.concatenate(patches, axis=-1)
    a = patches.reshape(N * Ho * Wo, KH * KW * Cin)
    b = w.reshape(KH * KW * Cin, Cout)
    out = matmul_affine(a, b, scale, bias, relu=relu, out_dtype=out_dtype)
    return out.reshape(N, Ho, Wo, Cout)


def conv2d_pallas(x, w, *, stride=1, padding=0, scale=None, bias=None, relu=False,
                  out_dtype=jnp.float32):
    """NHWC conv. scale/bias are per-output-channel (fused eval BN and/or conv bias)."""
    N, H, W, Cin = x.shape
    KH, KW, _, Cout = w.shape
    if scale is None:
        scale = jnp.ones((Cout,), jnp.float32)
    if bias is None:
        bias = jnp.zeros((Cout,), jnp.float32)

    if stride == 1:
        Hp, Wp = H + 2 * padding, W + 2 * padding
        Ho = Hp - KH + 1
        extra = 1 if KW > 1 else 0
        cin_p, tkc, cout_p, tnc = _fused_tiles(Cin, Cout)
        out_bytes = jnp.dtype(out_dtype).itemsize
        budget = _fused_vmem_budget()

        def vmem_needed(toh):
            tm_ = toh * Wp
            win_ = (toh + KH - 1 + extra) * Wp
            a_blk = N * win_ * tkc * 2
            b_blk = KH * KW * tkc * tnc * 2
            o_blk = N * tm_ * tnc * out_bytes
            acc = N * tm_ * tnc * 4
            return 2 * (a_blk + b_blk + o_blk) + acc + (2 << 20)  # 2 MiB margin

        tile_oh = max(1, Ho)
        while tile_oh > 1 and vmem_needed(tile_oh) > budget:
            tile_oh = (tile_oh + 1) // 2
        if vmem_needed(tile_oh) <= budget:
            return _conv2d_fused_taps(x, w, scale, bias, padding=padding, relu=relu,
                                      out_dtype=out_dtype, tile_oh=tile_oh)

    return _conv2d_im2col(x, w, scale, bias, stride=stride, padding=padding, relu=relu,
                          out_dtype=out_dtype)


def normalize_pallas(x, mean, std):
    """(x - mean) / std as x * (1/std) + (-mean/std); lanes carry W*C, not just C=3."""
    n, h, w, c = x.shape
    rows, cols = n * h, w * c
    x2 = x.reshape(rows, cols)
    inv = (1.0 / std).reshape(-1)
    scale = jnp.tile(inv, w).reshape(1, cols).astype(x.dtype)
    offset = jnp.tile((-mean.reshape(-1)) * inv, w).reshape(1, cols).astype(x.dtype)

    tr = min(512, _round_up(rows, 8))
    rp = _round_up(rows, tr)
    xp = jnp.pad(x2, ((0, rp - rows), (0, 0)))

    out = pl.pallas_call(
        _scale_offset_kernel,
        out_shape=jax.ShapeDtypeStruct((rp, cols), x.dtype),
        grid_spec=pltpu.PrefetchScalarGridSpec(
            num_scalar_prefetch=0,
            grid=(rp // tr,),
            in_specs=[
                pl.BlockSpec((tr, cols), lambda i: (i, 0)),
                pl.BlockSpec((1, cols), lambda i: (0, 0)),
                pl.BlockSpec((1, cols), lambda i: (0, 0)),
            ],
            out_specs=pl.BlockSpec((tr, cols), lambda i: (i, 0)),
        ),
        compiler_params=pltpu.CompilerParams(
            dimension_semantics=("parallel",),
            vmem_limit_bytes=_vmem_limit_bytes(),
        ),
        cost_estimate=pl.CostEstimate(flops=2 * rp * cols, transcendentals=0,
                                      bytes_accessed=8 * rp * cols),
    )(xp, scale, offset)
    return out[:rows].reshape(n, h, w, c)


# ----------------------------------------------------------------------------
# Bilinear resize (align_corners=True) as separable dense matmuls (MXU-friendly glue)
# ----------------------------------------------------------------------------
def _interp_matrix(src, dst):
    if dst == 1:
        pos = jnp.zeros((1,), jnp.float32)
    else:
        pos = jnp.arange(dst, dtype=jnp.float32) * ((src - 1) / (dst - 1))
    i0 = jnp.clip(jnp.floor(pos).astype(jnp.int32), 0, src - 1)
    i1 = jnp.minimum(i0 + 1, src - 1)
    frac = pos - i0.astype(jnp.float32)
    return (jax.nn.one_hot(i0, src, dtype=jnp.float32) * (1.0 - frac)[:, None]
            + jax.nn.one_hot(i1, src, dtype=jnp.float32) * frac[:, None])


def bilinear_ac(x, out_hw):
    """Bilinear resize, align_corners=True (matches F.interpolate); two small matmuls."""
    n, h, w, c = x.shape
    oh, ow = out_hw
    if (oh, ow) == (h, w):
        return x
    mh = _interp_matrix(h, oh)                       # (oh, h)
    mw = _interp_matrix(w, ow)                       # (ow, w)
    y = jnp.einsum("oh,nhwc->nowc", mh, x)
    return jnp.einsum("pw,nowc->nopc", mw, y)


# ----------------------------------------------------------------------------
# Parameter construction (deterministic; kaiming-normal like torch init)
# ----------------------------------------------------------------------------
def _kaiming(key, kh, kw, cin, cout):
    fan_in = kh * kw * cin
    return np.sqrt(2.0 / fan_in) * jax.random.normal(key, (kh, kw, cin, cout), jnp.float32)


def _uniform_bias(key, cin, kh, kw, cout):
    bound = 1.0 / np.sqrt(cin * kh * kw)
    return jax.random.uniform(key, (cout,), jnp.float32, -bound, bound)


def make_params(key, no_labels):
    ks = jax.random.split(key, 16)
    p = {}
    # Siam_kv convs
    p["wg_w"] = _kaiming(ks[0], 7, 7, 4, 64)
    p["wg_b"] = _uniform_bias(ks[1], 4, 7, 7, 64)
    p["key_w"] = _kaiming(ks[2], 3, 3, 2048, 2048 // 8)
    p["key_b"] = _uniform_bias(ks[3], 2048, 3, 3, 2048 // 8)
    p["val_w"] = _kaiming(ks[4], 3, 3, 2048, 2048 // 2)
    p["val_b"] = _uniform_bias(ks[5], 2048, 3, 3, 2048 // 2)
    # fused conv_key + conv_val weights (single Pallas conv, split afterwards)
    p["kv_w"] = jnp.concatenate([p["key_w"], p["val_w"]], axis=-1)   # (3,3,2048,1280)
    p["kv_b"] = jnp.concatenate([p["key_b"], p["val_b"]], axis=0)    # (1280,)
    # Decoder (conv weights kaiming; BN gamma=1, beta=0 -> fused eval scale BN_SCALE)
    p["dec_low_w"] = _kaiming(ks[6], 1, 1, 256, 48)
    p["ref1_w"] = _kaiming(ks[7], 3, 3, 256 + 48, 256)
    p["ref2_w"] = _kaiming(ks[8], 3, 3, 256, 256)
    p["pred1_w"] = _kaiming(ks[9], 3, 3, 256 + 64, 256)
    p["pred2_w"] = _kaiming(ks[10], 3, 3, 256, 256)
    p["pred3_w"] = _kaiming(ks[11], 1, 1, 256, no_labels)
    p["pred3_b"] = _uniform_bias(ks[12], 256, 1, 1, no_labels)
    # normalization buffers
    p["mean"] = jnp.array([0.485, 0.456, 0.406], jnp.float32).reshape(1, 1, 1, 3)
    p["std"] = jnp.array([0.229, 0.224, 0.225], jnp.float32).reshape(1, 1, 1, 3)
    return p


# ----------------------------------------------------------------------------
# Module pieces (mirroring Siam_kv methods defined in the file)
# ----------------------------------------------------------------------------
def extract_kv(p, f):
    """Siam_kv.extract_kv: conv_key / conv_val fused into one Pallas conv, output split.
    Output in bf16 — its consumer (STM_head) feeds the MXU anyway."""
    kv = conv2d_pallas(f, p["kv_w"], padding=1, bias=p["kv_b"], out_dtype=jnp.bfloat16)
    c_key = p["key_w"].shape[-1]
    return kv[..., :c_key], kv[..., c_key:]


def wg_conv(p, x_raw, mask):
    """self.wg_conv(torch.cat([(x-mean)/std, mask], 1)) with the normalization folded
    into the conv weights/bias (mathematically identical)."""
    w = p["wg_w"]
    mean = p["mean"].reshape(3)
    inv_std = 1.0 / p["std"].reshape(3)
    w_img = w[:, :, :3, :] * inv_std[None, None, :, None]
    w_f = jnp.concatenate([w_img, w[:, :, 3:, :]], axis=2)
    b_f = p["wg_b"] - jnp.sum(w_img * mean[None, None, :, None], axis=(0, 1, 2))
    m4 = jnp.concatenate([x_raw, mask], axis=-1)                     # (N,H,W,4)
    return conv2d_pallas(m4, w_f, stride=2, padding=3, bias=b_f)


def decoder_forward(p, ll, low_level_feat, out, no_labels):
    """Decoder.forward in eval mode (Dropout = identity, BN uses running stats).
    Intermediates are bf16 (their only consumers are further bf16 convs)."""
    bn48 = jnp.full((48,), BN_SCALE, jnp.float32)
    bn256 = jnp.full((256,), BN_SCALE, jnp.float32)
    z48 = jnp.zeros((48,), jnp.float32)
    z256 = jnp.zeros((256,), jnp.float32)

    out = bilinear_ac(out, low_level_feat.shape[1:3]).astype(jnp.bfloat16)
    low = conv2d_pallas(low_level_feat, p["dec_low_w"], scale=bn48, bias=z48, relu=True,
                        out_dtype=jnp.bfloat16)
    out = jnp.concatenate([out, low], axis=-1)                       # 256 + 48

    out2 = conv2d_pallas(out, p["ref1_w"], padding=1, scale=bn256, bias=z256, relu=True,
                         out_dtype=jnp.bfloat16)
    out2 = conv2d_pallas(out2, p["ref2_w"], padding=1, scale=bn256, bias=z256, relu=True,
                         out_dtype=jnp.bfloat16)

    out = bilinear_ac(out2, ll.shape[1:3]).astype(jnp.bfloat16)
    out = jnp.concatenate([out, ll.astype(jnp.bfloat16)], axis=-1)   # 256 + 64

    out = conv2d_pallas(out, p["pred1_w"], padding=1, scale=bn256, bias=z256, relu=True,
                        out_dtype=jnp.bfloat16)
    out = conv2d_pallas(out, p["pred2_w"], padding=1, scale=bn256, bias=z256, relu=True,
                        out_dtype=jnp.bfloat16)
    out = conv2d_pallas(out, p["pred3_w"], bias=p["pred3_b"])        # logits in f32

    h, w = out.shape[1:3]
    return bilinear_ac(out, (2 * h, 2 * w))


# TODO(synk): ResNet-50 backbones (backbone_m / backbone_q), ASPP, STM_head and the ROI
# machinery (mask2yxhw / get_ROI_grid / F.grid_sample) are external modules with no
# definitions provided; they are not implemented here. The full Siam_kv.forward composes
# them with the kernels above.
# TODO(synk): writing conv outputs directly into the next conv's pre-padded buffer
# (input_output_aliases) would remove the remaining trim/re-pad HBM passes.


# ----------------------------------------------------------------------------
# Demo
# ----------------------------------------------------------------------------
if __name__ == "__main__":
    NO_LABELS = 2
    key = jax.random.PRNGKey(0)
    kp, kx, km, kf, kll, kllf, ko = jax.random.split(key, 7)

    params = make_params(kp, NO_LABELS)

    # Small shapes consistent with the module's channel conventions
    # (a 32x32 crop instead of 256x256; backbone output stride 16 -> 2x2 ASPP input).
    x = jax.random.normal(kx, (2, 32, 32, 3), jnp.float32)           # image crop (NHWC)
    mask = jax.random.uniform(km, (2, 32, 32, 1), jnp.float32)       # soft mask
    feat = jax.random.normal(kf, (2, 4, 4, 2048), jnp.float32)       # backbone layer4 stand-in
    ll = jax.random.normal(kll, (2, 16, 16, 64), jnp.float32)        # after conv1+bn+relu
    low_level_feat = jax.random.normal(kllf, (2, 8, 8, 256), jnp.float32)  # after layer1
    aspp_out = jax.random.normal(ko, (2, 2, 2, 256), jnp.float32)    # ASPP output stand-in

    # standalone normalization (x - mean) / std (feeds the backbone stems — TODO above)
    x_norm = normalize_pallas(x, params["mean"], params["std"])

    # wg_conv branch of extract_feature_m (normalization folded into the conv)
    wg = wg_conv(params, x, mask)                                    # (2,16,16,64)

    # extract_kv on ref/prev features + memory concat (as in forward)
    ref_key, ref_val = extract_kv(params, feat)
    prev_key, prev_val = extract_kv(params, feat)
    mem_key = jnp.stack([ref_key, prev_key], axis=1)                 # (N, T=2, h, w, 256)
    mem_val = jnp.stack([ref_val, prev_val], axis=1)                 # (N, T=2, h, w, 1024)

    # Decoder
    dec_out = decoder_forward(params, ll, low_level_feat, aspp_out, NO_LABELS)

    for t in (x_norm, wg, mem_key, mem_val, dec_out):
        jax.block_until_ready(t)

    assert x_norm.shape == (2, 32, 32, 3)
    assert wg.shape == (2, 16, 16, 64)
    assert mem_key.shape == (2, 2, 4, 4, 256)
    assert mem_val.shape == (2, 2, 4, 4, 1024)
    assert dec_out.shape == (2, 32, 32, NO_LABELS)

    print("KERNEL_OK")
</pallas_src>

<mosaic_0001>
module attributes {stable_mosaic.version = 11 : i64} {
  func.func @_scale_offset_kernel(%arg0: i32, %arg1: memref<64x96xf32, #tpu.memory_space<vmem>>, %arg2: memref<1x96xf32, #tpu.memory_space<vmem>>, %arg3: memref<1x96xf32, #tpu.memory_space<vmem>>, %arg4: memref<64x96xf32, #tpu.memory_space<vmem>>) attributes {dimension_semantics = [#tpu.dimension_semantics<parallel>], iteration_bounds = array<i64: 1>, scalar_prefetch = 0 : i64, scratch_operands = 0 : i64, tpu.core_type = #tpu.core_type<tc>, window_params = [{transform_indices = @transform_0, window_bounds = array<i64: 64, 96>}, {pipeline_mode = #tpu.pipeline_mode<synchronous>, transform_indices = @transform_1, window_bounds = array<i64: 1, 96>}, {pipeline_mode = #tpu.pipeline_mode<synchronous>, transform_indices = @transform_2, window_bounds = array<i64: 1, 96>}, {transform_indices = @transform_3, window_bounds = array<i64: 64, 96>}]} {
    %c0 = arith.constant 0 : index
    %c0_0 = arith.constant 0 : index
    %0 = vector.load %arg1[%c0, %c0_0] : memref<64x96xf32, #tpu.memory_space<vmem>>, vector<64x96xf32>
    %c0_1 = arith.constant 0 : index
    %c0_2 = arith.constant 0 : index
    %1 = vector.load %arg2[%c0_1, %c0_2] : memref<1x96xf32, #tpu.memory_space<vmem>>, vector<1x96xf32>
    %2 = vector.broadcast %1 : vector<1x96xf32> to vector<64x96xf32>
    %3 = arith.mulf %0, %2 : vector<64x96xf32>
    %c0_3 = arith.constant 0 : index
    %c0_4 = arith.constant 0 : index
    %4 = vector.load %arg3[%c0_3, %c0_4] : memref<1x96xf32, #tpu.memory_space<vmem>>, vector<1x96xf32>
    %5 = vector.broadcast %4 : vector<1x96xf32> to vector<64x96xf32>
    %6 = arith.addf %3, %5 : vector<64x96xf32>
    %c0_5 = arith.constant 0 : index
    %c0_6 = arith.constant 0 : index
    %7 = vector.load %arg4[%c0_5, %c0_6] : memref<64x96xf32, #tpu.memory_space<vmem>>, vector<64x96xf32>
    tpu.vector_store %arg4[%c0_5, %c0_6], %6 {strides = array<i32>} : memref<64x96xf32, #tpu.memory_space<vmem>>, vector<64x96xf32>,
    return
  }
  func.func @transform_0(%arg0: i32) -> (i32, i32) {
    %c0_i32 = arith.constant 0 : i32
    %c0_i32_0 = arith.constant 0 : i32
    return %arg0, %c0_i32 : i32, i32
  }
  func.func @transform_1(%arg0: i32) -> (i32, i32) {
    %c0_i32 = arith.constant 0 : i32
    %c0_i32_0 = arith.constant 0 : i32
    %c0_i32_1 = arith.constant 0 : i32
    return %c0_i32, %c0_i32_0 : i32, i32
  }
  func.func @transform_2(%arg0: i32) -> (i32, i32) {
    %c0_i32 = arith.constant 0 : i32
    %c0_i32_0 = arith.constant 0 : i32
    %c0_i32_1 = arith.constant 0 : i32
    return %c0_i32, %c0_i32_0 : i32, i32
  }
  func.func @transform_3(%arg0: i32) -> (i32, i32) {
    %c0_i32 = arith.constant 0 : i32
    %c0_i32_0 = arith.constant 0 : i32
    return %arg0, %c0_i32 : i32, i32
  }
}

</mosaic_0001>

<bundles_post_ra>
// kernel: tpu_custom_call.1
= control target key start
LH: loop header
LB: loop body
LE: loop exit
PB: predicated region body
PF: predicated region fallthrough
CT: control target
= control target key end

     0   :  { %8 = vsyncpa [#allocation3], 0  ;;  %s215_s0 = inlined_call_operand.hbm [shape: f32[64,96], index: 0, kind: input, shape index: {}]   ;;  %s216_s1 = inlined_call_operand.vmem [shape: f32[1,96], index: 1, kind: input, shape index: {}]   ;;  %s217_s2 = inlined_call_operand.vmem [shape: f32[1,96], index: 2, kind: input, shape index: {}]   ;;  %s218_s3 = inlined_call_operand.hbm [shape: f32[64,96], index: 3, kind: output, shape index: {}]  }
   0x1   :  { %9 = vsyncpa [#allocation4], 0  ;;  %s147_s12 = smov [#allocation2]   ;;  %s99_s16 = scalar_lea.hbm %s215_s0, 1024 }
   0x2   :  { %s15_s13 = sshll.u32 %s147_s12, 4  ;;  %p100_p0 = scmp.ne.s32.totalorder %s215_s0, %s99_s16  ;;  %s16_s13 = int_to_ptr.vmem [resolvable:$true] %s15_s13 }
   0x3   :  { %p103_p1 = scmp.lt.u32.totalorder %s99_s16, %s215_s0 }
   0x5   :  { %p105_p2 = pnand %p103_p1, %p100_p0 }
   0x7   :  { %108 = shalt.err (!%p105_p2)
}
   0x8   :  { %s109_s21 = scalar_lea.vmem %s16_s13, 1024  ;;  %p114_p4 = scmp.lt.s32.totalorder %s16_s13, %s16_s13 }
   0x9   :  { %p110_p3 = scmp.ne.s32.totalorder %s16_s13, %s109_s21  ;;  %p115_p5 = scmp.lt.s32.totalorder %s109_s21, %s109_s21 }
   0xb   :  { %p116_p6 = por %p115_p5, %p114_p4 }
   0xd   :  { %p117_p7 = pnand %p116_p6, %p110_p3 }
   0xf   :  { %120 = shalt.err (!%p117_p7)
}
  0x10   :  { %s148_s22 = smov 128   ;;  %s149_s23 = smov 8  }
  0x11   :  { %21 = dma.hbm_to_vmem [thread:$0]  %s215_s0, 1024, %s16_s13, [#allocation3], %s148_s22, %s148_s22, %s149_s23  }
  0x12   :  { %143 = dma.done.wait [#allocation3], 1024  }
  0x13   :  { %144 = vsyncadd [#allocation3], 4294966272  ;;  %v29_v0 = vld [vmem:[#allocation2] sm:$0xff]  ;;  %v30_v4 = vld [vmem:[#allocation2 + $0x8] sm:$0xff]  ;;  %vm67_vm0 = vcmask 785408   ;;  %s150_s0 = smov [#allocation5]  }
  0x14   :  { %v93_v1 = vld [vmem:[%s216_s1] ss:$0 sm:$0xff]  ;;  %v31_v5 = vld [vmem:[#allocation2 + $0x10] sm:$0xff]  ;;  %v32_v6 = vld [vmem:[#allocation2 + $0x18] sm:$0xff]  ;;  %s81_s1 = sshll.u32 %s150_s0, 4  ;;  %s82_s1 = int_to_ptr.vmem [resolvable:$true] %s81_s1 }
  0x15   :  { %v94_v2 = vld [vmem:[%s217_s2] ss:$0 sm:$0xff]  ;;  %v44_v3 = vmul.f32 %v93_v1, %v29_v0  ;;  %v45_v7 = vmul.f32 %v93_v1, %v30_v4  ;;  %v46_v8 = vmul.f32 %v93_v1, %v31_v5  ;;  %v47_v9 = vmul.f32 %v93_v1, %v32_v6  ;;  %v34_v11 = vld [vmem:[#allocation2 + $0x28] sm:$0xff]  ;;  %v35_v12 = vld [vmem:[#allocation2 + $0x30] sm:$0xff]  ;;  %s121_s2 = scalar_lea.vmem %s82_s1, 1024  ;;  %p126_p9 = scmp.lt.s32.totalorder %s82_s1, %s82_s1 }
  0x16   :  { %v33_v10 = vld [vmem:[#allocation2 + $0x20] sm:$0xff]  ;;  %v49_v15 = vmul.f32 %v93_v1, %v34_v11  ;;  %v50_v16 = vmul.f32 %v93_v1, %v35_v12  ;;  %v36_v17 = vld [vmem:[#allocation2 + $0x38] sm:$0xff]  ;;  %p122_p8 = scmp.ne.s32.totalorder %s82_s1, %s121_s2  ;;  %p127_p10 = scmp.lt.s32.totalorder %s121_s2, %s121_s2 }
  0x17   :  { %v59_v13 = vadd.f32 %v94_v2, %v44_v3  ;;  %v48_v14 = vmul.f32 %v93_v1, %v33_v10  ;;  %v60_v18 = vadd.f32 %v94_v2, %v45_v7  ;;  %v61_v19 = vadd.f32 %v94_v2, %v46_v8 }
  0x18   :  { %v62_v20 = vadd.f32 %v94_v2, %v47_v9  ;;  %v51_v21 = vmul.f32 %v93_v1, %v36_v17  ;;  %v64_v23 = vadd.f32 %v94_v2, %v49_v15  ;;  %v65_v24 = vadd.f32 %v94_v2, %v50_v16  ;;  %p128_p11 = por %p127_p10, %p126_p9 }
  0x19   :  { %68 = vst.msk [vmem:[#allocation5] sm:$0xff] %vm67_vm0, %v59_v13  ;;  %v63_v22 = vadd.f32 %v94_v2, %v48_v14  ;;  %69 = vst.msk [vmem:[#allocation5 + $0x8] sm:$0xff] %vm67_vm0, %v60_v18 }
  0x1a   :  { %70 = vst.msk [vmem:[#allocation5 + $0x10] sm:$0xff] %vm67_vm0, %v61_v19  ;;  %71 = vst.msk [vmem:[#allocation5 + $0x18] sm:$0xff] %vm67_vm0, %v62_v20  ;;  %v66_v25 = vadd.f32 %v94_v2, %v51_v21  ;;  %p129_p12 = pnand %p128_p11, %p122_p8 }
  0x1b   :  { %72 = vst.msk [vmem:[#allocation5 + $0x20] sm:$0xff] %vm67_vm0, %v63_v22  ;;  %73 = vst.msk [vmem:[#allocation5 + $0x28] sm:$0xff] %vm67_vm0, %v64_v23 }
  0x1c   :  { %74 = vst.msk [vmem:[#allocation5 + $0x30] sm:$0xff] %vm67_vm0, %v65_v24  ;;  %75 = vst.msk [vmem:[#allocation5 + $0x38] sm:$0xff] %vm67_vm0, %v66_v25 }
  0x1d   :  { %132 = shalt.err (!%p129_p12)
}
  0x1e   :  { %s133_s5 = scalar_lea.hbm %s218_s3, 1024 }
  0x1f   :  { %p134_p13 = scmp.ne.s32.totalorder %s218_s3, %s133_s5  ;;  %p137_p0 = scmp.lt.u32.totalorder %s133_s5, %s218_s3 }
  0x21   :  { %p139_p1 = pnand %p137_p0, %p134_p13 }
  0x23   :  { %142 = shalt.err (!%p139_p1)
}
  0x24   :  { %87 = dma.vmem_to_hbm [thread:$0]  %s82_s1, 1024, %s218_s3, [#allocation4], %s148_s22, %s148_s22, %s149_s23  }
  0x25   :  { %145 = dma.done.wait [#allocation4], 1024  }
  0x26   :  { %146 = vsyncadd [#allocation4], 4294966272 }
  0x27   :  { %91 = vsyncpa [#allocation3], 1 }
  0x28   :  { %92 = vsyncpa [#allocation4], 1 }

</bundles_post_ra>
